<compile_context>
chip_gen: v6e
topology: v6e:2x2x1
jax: 0.10.0
libtpu: 0.0.40
codegen_flags: <defaults>
</compile_context>

<pallas_src>
import jax
import jax.numpy as jnp
from jax.experimental import pallas as pl
from jax.experimental.pallas import tpu as pltpu


def _sigmoid(x):
    # exp and the approximate reciprocal both issue on the EUP slot, keeping the
    # VALU free for the gate elementwise math.
    return pl.reciprocal(1.0 + jnp.exp(-x), approx=True)


def _vdlstm_kernel(z_ref, h0_ref, c0_ref,
                   w_vae_ref, wih_ref, whh_ref, w_out_ref, bias_ref,
                   re_ref, h1_ref, c1_ref):
    """One batch-tile of the VisionDecoderLSTM step.

    z_ref    : (tb, z_dim)  f32/bf16      h0_ref/c0_ref : (tb, feat)
    w_vae_ref: (z_dim, hid) bf16          (folded linear_h2h @ linear_z2h)
    wih_ref  : (hid, 4*feat) bf16         whh_ref : (feat, 4*feat) bf16
    w_out_ref: (feat, feat) bf16          (folded linear_out2 @ linear_out1)
    bias_ref : (1, HB + 5*feat) f32 packed biases:
               [0:hid]            folded VAE bias
               [HB:HB+4*feat]     b_ih + b_hh   (HB = round_up(hid, 128))
               [HB+4*feat:HB+5*feat] folded linear_out bias
    outputs  : re_feature, h_1, c_1 each (tb, feat)
    """
    f32 = jnp.float32
    mxu_dt = w_vae_ref.dtype

    feat = c0_ref.shape[1]
    hid = w_vae_ref.shape[1]
    hb = bias_ref.shape[1] - 5 * feat   # 128-aligned offset of the LSTM bias block

    z = z_ref[...].astype(mxu_dt)
    h0 = h0_ref[...]
    c0 = c0_ref[...].astype(f32)

    # Fused VAE_decode: tanh(z @ W_vae + b_vae) — single MXU matmul.
    t = jnp.dot(z, w_vae_ref[...], preferred_element_type=f32) + bias_ref[:, :hid]
    ve = jnp.tanh(t).astype(mxu_dt)
    # TODO(synk): nn.Dropout is the identity in eval mode; training-mode
    # Bernoulli dropout masks are not implemented in this kernel.

    # LSTMCell gates in PyTorch order (i, f, g, o) along the lane axis.
    gates = (jnp.dot(ve, wih_ref[...], preferred_element_type=f32)
             + jnp.dot(h0.astype(mxu_dt), whh_ref[...], preferred_element_type=f32)
             + bias_ref[:, hb:hb + 4 * feat])
    i_g = _sigmoid(gates[:, 0 * feat:1 * feat])
    f_g = _sigmoid(gates[:, 1 * feat:2 * feat])
    g_g = jnp.tanh(gates[:, 2 * feat:3 * feat])
    o_g = _sigmoid(gates[:, 3 * feat:4 * feat])
    c1 = f_g * c0 + i_g * g_g
    h1 = o_g * jnp.tanh(c1)

    # Fused linear_out: h1 @ W_out + b_out — single MXU matmul (dropout == id at eval).
    re = (jnp.dot(h1.astype(mxu_dt), w_out_ref[...], preferred_element_type=f32)
          + bias_ref[:, hb + 4 * feat:hb + 5 * feat])

    re_ref[...] = re.astype(re_ref.dtype)
    h1_ref[...] = h1.astype(h1_ref.dtype)
    c1_ref[...] = c1.astype(c1_ref.dtype)


def _round_up(x, m):
    return ((x + m - 1) // m) * m


def _sublane_multiple(dtype):
    # 8 rows for 4-byte dtypes, 16 for bf16/fp16, 32 for int8/fp8.
    return max(8, 32 // jnp.dtype(dtype).itemsize)


def vision_decoder_lstm(z, h_0, c_0, params, *, max_tile_b=128,
                        weight_dtype=jnp.bfloat16, donate_state=False):
    """Pallas wrapper. `params` holds PyTorch-layout weights (out, in) / (out,).

    Returns (re_feature, h_1, c_1), each (B, feature_size).
    Assumes eval-mode dropout (identity).  If donate_state=True, h_0/c_0 buffers
    are aliased into h_1/c_1 and must not be used by the caller afterwards."""
    B, z_dim = z.shape
    feat = h_0.shape[1]
    hid = params["w_z2h"].shape[0]
    f32 = jnp.float32

    # ---- constant-fold the two chained Linear pairs (exact: no nonlinearity between) ----
    w_z2h = params["w_z2h"].astype(f32)
    b_z2h = params["b_z2h"].astype(f32)
    w_h2h = params["w_h2h"].astype(f32)
    b_h2h = params["b_h2h"].astype(f32)
    w_vae = (w_h2h @ w_z2h).T                      # (z_dim, hid)
    b_vae = b_z2h @ w_h2h.T + b_h2h                # (hid,)

    w_o1 = params["w_out1"].astype(f32)
    b_o1 = params["b_out1"].astype(f32)
    w_o2 = params["w_out2"].astype(f32)
    b_o2 = params["b_out2"].astype(f32)
    w_out = (w_o2 @ w_o1).T                        # (feat, feat)
    b_out = b_o1 @ w_o2.T + b_o2                   # (feat,)

    wih = params["w_ih"].T                         # (hid, 4*feat)
    whh = params["w_hh"].T                         # (feat, 4*feat)
    b_lstm = params["b_ih"].astype(f32) + params["b_hh"].astype(f32)

    # bf16 weights into the MXU: halves weight HBM->VMEM traffic and VMEM use.
    w_vae = w_vae.astype(weight_dtype)
    wih = wih.astype(weight_dtype)
    whh = whh.astype(weight_dtype)
    w_out = w_out.astype(weight_dtype)

    # Pack the three bias rows into one (1, P) f32 array at 128-aligned offsets.
    hb = _round_up(hid, 128)
    bias = jnp.zeros((1, hb + 5 * feat), f32)
    bias = bias.at[0, :hid].set(b_vae)
    bias = bias.at[0, hb:hb + 4 * feat].set(b_lstm)
    bias = bias.at[0, hb + 4 * feat:].set(b_out)

    # ---- batch tiling: dtype-aware sublane rounding, no megacore split of tiny batches ----
    sub = _sublane_multiple(h_0.dtype)
    if B < 2 * max_tile_b:
        tile_b = _round_up(B, sub)                 # single grid step
    else:
        tile_b = _round_up(max_tile_b, sub)        # shard across TCs only when it pays off
    pad_b = _round_up(B, tile_b)
    if pad_b != B:
        pad = [(0, pad_b - B), (0, 0)]
        z = jnp.pad(z, pad)
        h_0 = jnp.pad(h_0, pad)
        c_0 = jnp.pad(c_0, pad)
    grid = (pad_b // tile_b,)

    def row_spec(cols):
        return pl.BlockSpec((tile_b, cols), lambda i: (i, 0))

    def resident_spec(arr):
        # Constant index_map -> block stays resident across the batch grid.
        return pl.BlockSpec(arr.shape, lambda i: (0, 0))

    out_shapes = tuple(jax.ShapeDtypeStruct((pad_b, feat), h_0.dtype) for _ in range(3))
    out_specs = tuple(row_spec(feat) for _ in range(3))
    io_aliases = {1: 1, 2: 2} if donate_state else {}   # h_0 -> h_1, c_0 -> c_1

    fn = pl.pallas_call(
        _vdlstm_kernel,
        out_shape=out_shapes,
        grid=grid,
        in_specs=[
            row_spec(z_dim), row_spec(feat), row_spec(feat),
            resident_spec(w_vae), resident_spec(wih), resident_spec(whh),
            resident_spec(w_out), resident_spec(bias),
        ],
        out_specs=out_specs,
        input_output_aliases=io_aliases,
        compiler_params=pltpu.CompilerParams(
            dimension_semantics=("parallel",)),
    )
    re, h1, c1 = fn(z, h_0, c_0, w_vae, wih, whh, w_out, bias)
    return re[:B], h1[:B], c1[:B]


def _reference(z, h0, c0, p):
    """Pure-JAX f32 reference mirroring the PyTorch forward exactly (eval mode)."""
    sig = lambda x: 1.0 / (1.0 + jnp.exp(-x))
    ve = jnp.tanh((z @ p["w_z2h"].T + p["b_z2h"]) @ p["w_h2h"].T + p["b_h2h"])
    gates = ve @ p["w_ih"].T + p["b_ih"] + h0 @ p["w_hh"].T + p["b_hh"]
    feat = h0.shape[1]
    i = sig(gates[:, :feat])
    f = sig(gates[:, feat:2 * feat])
    g = jnp.tanh(gates[:, 2 * feat:3 * feat])
    o = sig(gates[:, 3 * feat:])
    c1 = f * c0 + i * g
    h1 = o * jnp.tanh(c1)
    re = (h1 @ p["w_out1"].T + p["b_out1"]) @ p["w_out2"].T + p["b_out2"]
    return re, h1, c1


if __name__ == "__main__":
    # Small, deterministic shapes consistent with the module
    # (hidden_size=32, z_dim=32, feature_size kept lane-dense at 128).
    B, z_dim, hidden_size, feature_size = 2, 32, 32, 128

    key = jax.random.PRNGKey(0)
    ks = jax.random.split(key, 15)
    sc = 0.1
    params = {
        # nn.Linear(z_dim, hidden): weight (hid, z_dim), bias (hid,)
        "w_z2h": jax.random.normal(ks[0], (hidden_size, z_dim), jnp.float32) * sc,
        "b_z2h": jax.random.normal(ks[1], (hidden_size,), jnp.float32) * sc,
        # nn.Linear(hidden, hidden)
        "w_h2h": jax.random.normal(ks[2], (hidden_size, hidden_size), jnp.float32) * sc,
        "b_h2h": jax.random.normal(ks[3], (hidden_size,), jnp.float32) * sc,
        # nn.LSTMCell(hidden_size, feature_size): W_ih (4F, hid), W_hh (4F, F)
        "w_ih": jax.random.normal(ks[4], (4 * feature_size, hidden_size), jnp.float32) * sc,
        "w_hh": jax.random.normal(ks[5], (4 * feature_size, feature_size), jnp.float32) * sc,
        "b_ih": jax.random.normal(ks[6], (4 * feature_size,), jnp.float32) * sc,
        "b_hh": jax.random.normal(ks[7], (4 * feature_size,), jnp.float32) * sc,
        # nn.Sequential(Linear(F, F), Linear(F, F))
        "w_out1": jax.random.normal(ks[8], (feature_size, feature_size), jnp.float32) * sc,
        "b_out1": jax.random.normal(ks[9], (feature_size,), jnp.float32) * sc,
        "w_out2": jax.random.normal(ks[10], (feature_size, feature_size), jnp.float32) * sc,
        "b_out2": jax.random.normal(ks[11], (feature_size,), jnp.float32) * sc,
    }
    z = jax.random.normal(ks[12], (B, z_dim), jnp.float32)
    h_0 = jax.random.normal(ks[13], (B, feature_size), jnp.float32)
    c_0 = jax.random.normal(ks[14], (B, feature_size), jnp.float32)

    re, h1, c1 = vision_decoder_lstm(z, h_0, c_0, params)
    jax.block_until_ready((re, h1, c1))

    re_r, h1_r, c1_r = _reference(z, h_0, c_0, params)
    assert re.shape == (B, feature_size)
    assert h1.shape == (B, feature_size) and c1.shape == (B, feature_size)
    # Tolerances account for bf16 MXU inputs + approximate EUP reciprocal.
    assert jnp.allclose(c1, c1_r, atol=3e-2, rtol=3e-2)
    assert jnp.allclose(h1, h1_r, atol=3e-2, rtol=3e-2)
    assert jnp.allclose(re, re_r, atol=3e-2, rtol=3e-2)

    print("KERNEL_OK")
</pallas_src>

<mosaic_0001>
module attributes {stable_mosaic.version = 11 : i64} {
  func.func @_vdlstm_kernel(%arg0: i32, %arg1: memref<8x32xf32, #tpu.memory_space<vmem>>, %arg2: memref<8x128xf32, #tpu.memory_space<vmem>>, %arg3: memref<8x128xf32, #tpu.memory_space<vmem>>, %arg4: memref<32x32xbf16, #tpu.memory_space<vmem>>, %arg5: memref<32x512xbf16, #tpu.memory_space<vmem>>, %arg6: memref<128x512xbf16, #tpu.memory_space<vmem>>, %arg7: memref<128x128xbf16, #tpu.memory_space<vmem>>, %arg8: memref<1x768xf32, #tpu.memory_space<vmem>>, %arg9: memref<8x128xf32, #tpu.memory_space<vmem>>, %arg10: memref<8x128xf32, #tpu.memory_space<vmem>>, %arg11: memref<8x128xf32, #tpu.memory_space<vmem>>) attributes {dimension_semantics = [#tpu.dimension_semantics<parallel>], iteration_bounds = array<i64: 1>, scalar_prefetch = 0 : i64, scratch_operands = 0 : i64, tpu.core_type = #tpu.core_type<tc>, window_params = [{transform_indices = @transform_0, window_bounds = array<i64: 8, 32>}, {transform_indices = @transform_1, window_bounds = array<i64: 8, 128>}, {transform_indices = @transform_2, window_bounds = array<i64: 8, 128>}, {pipeline_mode = #tpu.pipeline_mode<synchronous>, transform_indices = @transform_3, window_bounds = array<i64: 32, 32>}, {pipeline_mode = #tpu.pipeline_mode<synchronous>, transform_indices = @transform_4, window_bounds = array<i64: 32, 512>}, {pipeline_mode = #tpu.pipeline_mode<synchronous>, transform_indices = @transform_5, window_bounds = array<i64: 128, 512>}, {pipeline_mode = #tpu.pipeline_mode<synchronous>, transform_indices = @transform_6, window_bounds = array<i64: 128, 128>}, {pipeline_mode = #tpu.pipeline_mode<synchronous>, transform_indices = @transform_7, window_bounds = array<i64: 1, 768>}, {transform_indices = @transform_8, window_bounds = array<i64: 8, 128>}, {transform_indices = @transform_9, window_bounds = array<i64: 8, 128>}, {transform_indices = @transform_10, window_bounds = array<i64: 8, 128>}]} {
    %c0 = arith.constant 0 : index
    %c0_0 = arith.constant 0 : index
    %0 = vector.load %arg1[%c0, %c0_0] : memref<8x32xf32, #tpu.memory_space<vmem>>, vector<8x32xf32>
    %1 = arith.truncf %0 : vector<8x32xf32> to vector<8x32xbf16>
    %c0_1 = arith.constant 0 : index
    %c0_2 = arith.constant 0 : index
    %2 = vector.load %arg2[%c0_1, %c0_2] : memref<8x128xf32, #tpu.memory_space<vmem>>, vector<8x128xf32>
    %c0_3 = arith.constant 0 : index
    %c0_4 = arith.constant 0 : index
    %3 = vector.load %arg3[%c0_3, %c0_4] : memref<8x128xf32, #tpu.memory_space<vmem>>, vector<8x128xf32>
    %c0_5 = arith.constant 0 : index
    %c0_6 = arith.constant 0 : index
    %4 = vector.load %arg4[%c0_5, %c0_6] : memref<32x32xbf16, #tpu.memory_space<vmem>>, vector<32x32xbf16>
    %cst = arith.constant dense<0.000000e+00> : vector<8x32xf32>
    %5 = tpu.matmul %1, %4, %cst {dimension_numbers = #tpu.dot_dimension_numbers<[1], [0], [0], [1], [0, 0, 1, 1], [], []>} : vector<8x32xbf16>, vector<32x32xbf16>, vector<8x32xf32> -> vector<8x32xf32>
    %c0_7 = arith.constant 0 : index
    %c0_8 = arith.constant 0 : index
    %6 = vector.load %arg8[%c0_7, %c0_8] : memref<1x768xf32, #tpu.memory_space<vmem>>, vector<1x32xf32>
    %7 = vector.broadcast %6 : vector<1x32xf32> to vector<8x32xf32>
    %8 = arith.addf %5, %7 : vector<8x32xf32>
    %9 = math.tanh %8 : vector<8x32xf32>
    %10 = arith.truncf %9 : vector<8x32xf32> to vector<8x32xbf16>
    %c0_9 = arith.constant 0 : index
    %c0_10 = arith.constant 0 : index
    %11 = vector.load %arg5[%c0_9, %c0_10] : memref<32x512xbf16, #tpu.memory_space<vmem>>, vector<32x512xbf16>
    %cst_11 = arith.constant dense<0.000000e+00> : vector<8x512xf32>
    %12 = tpu.matmul %10, %11, %cst_11 {dimension_numbers = #tpu.dot_dimension_numbers<[1], [0], [0], [1], [0, 0, 1, 1], [], []>} : vector<8x32xbf16>, vector<32x512xbf16>, vector<8x512xf32> -> vector<8x512xf32>
    %13 = arith.truncf %2 : vector<8x128xf32> to vector<8x128xbf16>
    %c0_12 = arith.constant 0 : index
    %c0_13 = arith.constant 0 : index
    %14 = vector.load %arg6[%c0_12, %c0_13] : memref<128x512xbf16, #tpu.memory_space<vmem>>, vector<128x512xbf16>
    %cst_14 = arith.constant dense<0.000000e+00> : vector<8x512xf32>
    %15 = tpu.matmul %13, %14, %cst_14 {dimension_numbers = #tpu.dot_dimension_numbers<[1], [0], [0], [1], [0, 0, 1, 1], [], []>} : vector<8x128xbf16>, vector<128x512xbf16>, vector<8x512xf32> -> vector<8x512xf32>
    %16 = arith.addf %12, %15 : vector<8x512xf32>
    %c0_15 = arith.constant 0 : index
    %c128 = arith.constant 128 : index
    %17 = vector.load %arg8[%c0_15, %c128] : memref<1x768xf32, #tpu.memory_space<vmem>>, vector<1x512xf32>
    %18 = vector.broadcast %17 : vector<1x512xf32> to vector<8x512xf32>
    %19 = arith.addf %16, %18 : vector<8x512xf32>
    %20 = vector.extract_strided_slice %19 {offsets = [0, 0], sizes = [8, 128], strides = [1, 1]} : vector<8x512xf32> to vector<8x128xf32>
    %cst_16 = arith.constant 0.000000e+00 : f32
    %21 = vector.broadcast %cst_16 : f32 to vector<8x128xf32>
    %22 = arith.subf %21, %20 : vector<8x128xf32>
    %23 = math.exp %22 : vector<8x128xf32>
    %cst_17 = arith.constant 1.000000e+00 : f32
    %24 = vector.broadcast %cst_17 : f32 to vector<8x128xf32>
    %25 = arith.addf %24, %23 : vector<8x128xf32>
    %26 = tpu.reciprocal %25 {approx = true} : vector<8x128xf32> -> vector<8x128xf32>
    %27 = vector.extract_strided_slice %19 {offsets = [0, 128], sizes = [8, 128], strides = [1, 1]} : vector<8x512xf32> to vector<8x128xf32>
    %cst_18 = arith.constant 0.000000e+00 : f32
    %28 = vector.broadcast %cst_18 : f32 to vector<8x128xf32>
    %29 = arith.subf %28, %27 : vector<8x128xf32>
    %30 = math.exp %29 : vector<8x128xf32>
    %cst_19 = arith.constant 1.000000e+00 : f32
    %31 = vector.broadcast %cst_19 : f32 to vector<8x128xf32>
    %32 = arith.addf %31, %30 : vector<8x128xf32>
    %33 = tpu.reciprocal %32 {approx = true} : vector<8x128xf32> -> vector<8x128xf32>
    %34 = vector.extract_strided_slice %19 {offsets = [0, 256], sizes = [8, 128], strides = [1, 1]} : vector<8x512xf32> to vector<8x128xf32>
    %35 = math.tanh %34 : vector<8x128xf32>
    %36 = vector.extract_strided_slice %19 {offsets = [0, 384], sizes = [8, 128], strides = [1, 1]} : vector<8x512xf32> to vector<8x128xf32>
    %cst_20 = arith.constant 0.000000e+00 : f32
    %37 = vector.broadcast %cst_20 : f32 to vector<8x128xf32>
    %38 = arith.subf %37, %36 : vector<8x128xf32>
    %39 = math.exp %38 : vector<8x128xf32>
    %cst_21 = arith.constant 1.000000e+00 : f32
    %40 = vector.broadcast %cst_21 : f32 to vector<8x128xf32>
    %41 = arith.addf %40, %39 : vector<8x128xf32>
    %42 = tpu.reciprocal %41 {approx = true} : vector<8x128xf32> -> vector<8x128xf32>
    %43 = arith.mulf %33, %3 : vector<8x128xf32>
    %44 = arith.mulf %26, %35 : vector<8x128xf32>
    %45 = arith.addf %43, %44 : vector<8x128xf32>
    %46 = math.tanh %45 : vector<8x128xf32>
    %47 = arith.mulf %42, %46 : vector<8x128xf32>
    %48 = arith.truncf %47 : vector<8x128xf32> to vector<8x128xbf16>
    %c0_22 = arith.constant 0 : index
    %c0_23 = arith.constant 0 : index
    %49 = vector.load %arg7[%c0_22, %c0_23] : memref<128x128xbf16, #tpu.memory_space<vmem>>, vector<128x128xbf16>
    %cst_24 = arith.constant dense<0.000000e+00> : vector<8x128xf32>
    %50 = tpu.matmul %48, %49, %cst_24 {dimension_numbers = #tpu.dot_dimension_numbers<[1], [0], [0], [1], [0, 0, 1, 1], [], []>} : vector<8x128xbf16>, vector<128x128xbf16>, vector<8x128xf32> -> vector<8x128xf32>
    %c0_25 = arith.constant 0 : index
    %c640 = arith.constant 640 : index
    %51 = vector.load %arg8[%c0_25, %c640] : memref<1x768xf32, #tpu.memory_space<vmem>>, vector<1x128xf32>
    %52 = vector.broadcast %51 : vector<1x128xf32> to vector<8x128xf32>
    %53 = arith.addf %50, %52 : vector<8x128xf32>
    %c0_26 = arith.constant 0 : index
    %c0_27 = arith.constant 0 : index
    %54 = vector.load %arg9[%c0_26, %c0_27] : memref<8x128xf32, #tpu.memory_space<vmem>>, vector<8x128xf32>
    tpu.vector_store %arg9[%c0_26, %c0_27], %53 {strides = array<i32>} : memref<8x128xf32, #tpu.memory_space<vmem>>, vector<8x128xf32>,
    %c0_28 = arith.constant 0 : index
    %c0_29 = arith.constant 0 : index
    %55 = vector.load %arg10[%c0_28, %c0_29] : memref<8x128xf32, #tpu.memory_space<vmem>>, vector<8x128xf32>
    tpu.vector_store %arg10[%c0_28, %c0_29], %47 {strides = array<i32>} : memref<8x128xf32, #tpu.memory_space<vmem>>, vector<8x128xf32>,
    %c0_30 = arith.constant 0 : index
    %c0_31 = arith.constant 0 : index
    %56 = vector.load %arg11[%c0_30, %c0_31] : memref<8x128xf32, #tpu.memory_space<vmem>>, vector<8x128xf32>
    tpu.vector_store %arg11[%c0_30, %c0_31], %45 {strides = array<i32>} : memref<8x128xf32, #tpu.memory_space<vmem>>, vector<8x128xf32>,
    return
  }
  func.func @transform_0(%arg0: i32) -> (i32, i32) {
    %c0_i32 = arith.constant 0 : i32
    %c0_i32_0 = arith.constant 0 : i32
    return %arg0, %c0_i32 : i32, i32
  }
  func.func @transform_1(%arg0: i32) -> (i32, i32) {
    %c0_i32 = arith.constant 0 : i32
    %c0_i32_0 = arith.constant 0 : i32
    return %arg0, %c0_i32 : i32, i32
  }
  func.func @transform_2(%arg0: i32) -> (i32, i32) {
    %c0_i32 = arith.constant 0 : i32
    %c0_i32_0 = arith.constant 0 : i32
    return %arg0, %c0_i32 : i32, i32
  }
  func.func @transform_3(%arg0: i32) -> (i32, i32) {
    %c0_i32 = arith.constant 0 : i32
    %c0_i32_0 = arith.constant 0 : i32
    %c0_i32_1 = arith.constant 0 : i32
    return %c0_i32, %c0_i32_0 : i32, i32
  }
  func.func @transform_4(%arg0: i32) -> (i32, i32) {
    %c0_i32 = arith.constant 0 : i32
    %c0_i32_0 = arith.constant 0 : i32
    %c0_i32_1 = arith.constant 0 : i32
    return %c0_i32, %c0_i32_0 : i32, i32
  }
  func.func @transform_5(%arg0: i32) -> (i32, i32) {
    %c0_i32 = arith.constant 0 : i32
    %c0_i32_0 = arith.constant 0 : i32
    %c0_i32_1 = arith.constant 0 : i32
    return %c0_i32, %c0_i32_0 : i32, i32
  }
  func.func @transform_6(%arg0: i32) -> (i32, i32) {
    %c0_i32 = arith.constant 0 : i32
    %c0_i32_0 = arith.constant 0 : i32
    %c0_i32_1 = arith.constant 0 : i32
    return %c0_i32, %c0_i32_0 : i32, i32
  }
  func.func @transform_7(%arg0: i32) -> (i32, i32) {
    %c0_i32 = arith.constant 0 : i32
    %c0_i32_0 = arith.constant 0 : i32
    %c0_i32_1 = arith.constant 0 : i32
    return %c0_i32, %c0_i32_0 : i32, i32
  }
  func.func @transform_8(%arg0: i32) -> (i32, i32) {
    %c0_i32 = arith.constant 0 : i32
    %c0_i32_0 = arith.constant 0 : i32
    return %arg0, %c0_i32 : i32, i32
  }
  func.func @transform_9(%arg0: i32) -> (i32, i32) {
    %c0_i32 = arith.constant 0 : i32
    %c0_i32_0 = arith.constant 0 : i32
    return %arg0, %c0_i32 : i32, i32
  }
  func.func @transform_10(%arg0: i32) -> (i32, i32) {
    %c0_i32 = arith.constant 0 : i32
    %c0_i32_0 = arith.constant 0 : i32
    return %arg0, %c0_i32 : i32, i32
  }
}

</mosaic_0001>

<bundles_post_ra>
// kernel: tpu_custom_call.1
= control target key start
LH: loop header
LB: loop body
LE: loop exit
PB: predicated region body
PF: predicated region fallthrough
CT: control target
= control target key end

     0   :  { %16 = vsyncpa [#allocation3], 0  ;;  %s1364_s0 = inlined_call_operand.hbm [shape: f32[8,32], index: 0, kind: input, shape index: {}]   ;;  %s1365_s1 = inlined_call_operand.hbm [shape: f32[8,128], index: 1, kind: input, shape index: {}]   ;;  %s1366_s2 = inlined_call_operand.hbm [shape: f32[8,128], index: 2, kind: input, shape index: {}]   ;;  %s1367_s3 = inlined_call_operand.hbm [shape: bf16[32,32], index: 3, kind: input, shape index: {}]   ;;  %s1368_s4 = inlined_call_operand.hbm [shape: bf16[32,512], index: 4, kind: input, shape index: {}]   ;;  %s1369_s5 = inlined_call_operand.hbm [shape: bf16[128,512], index: 5, kind: input, shape index: {}]   ;;  %s1370_s6 = inlined_call_operand.hbm [shape: bf16[128,128], index: 6, kind: input, shape index: {}]   ;;  %s1371_s7 = inlined_call_operand.vmem [shape: f32[1,768], index: 7, kind: input, shape index: {}]   ;;  %s1372_s8 = inlined_call_operand.hbm [shape: f32[8,128], index: 8, kind: output, shape index: {0}]   ;;  %s1373_s9 = inlined_call_operand.hbm [shape: f32[8,128], index: 9, kind: output, shape index: {1}]   ;;  %s1374_s10 = inlined_call_operand.hbm [shape: f32[8,128], index: 10, kind: output, shape index: {2}]  }
   0x1   :  { %17 = vsyncpa [#allocation6], 0 }
   0x2   :  { %18 = vsyncpa [#allocation9], 0 }
   0x3   :  { %19 = vsyncpa [#allocation12], 0 }
   0x4   :  { %20 = vsyncpa [#allocation4], 0 }
   0x5   :  { %21 = vsyncpa [#allocation16], 0  ;;  %s1224_s13 = smov [#allocation5]   ;;  %s1225_s15 = smov [#allocation8]  }
   0x6   :  { %s38_s14 = sshll.u32 %s1224_s13, 4  ;;  %s57_s16 = sshll.u32 %s1225_s15, 4  ;;  %s39_s14 = int_to_ptr.vmem [resolvable:$true] %s38_s14  ;;  %s58_s16 = int_to_ptr.vmem [resolvable:$true] %s57_s16 }
   0x7   :  { %s1020_s17 = scalar_lea.vmem %s39_s14, 128  ;;  %p1025_p1 = scmp.lt.s32.totalorder %s39_s14, %s39_s14 }
   0x8   :  { %p1021_p0 = scmp.ne.s32.totalorder %s39_s14, %s1020_s17  ;;  %p1026_p2 = scmp.lt.s32.totalorder %s1020_s17, %s1020_s17 }
   0xa   :  { %p1027_p3 = por %p1026_p2, %p1025_p1 }
   0xc   :  { %p1028_p4 = pnand %p1027_p3, %p1021_p0 }
   0xe   :  { %1031 = shalt.err (!%p1028_p4)
}
   0xf   :  { %41 = dma.hbm_to_vmem [thread:$0]  %s1365_s1, 128, %s39_s14, [#allocation6]  }
  0x10   :  { %s1040_s20 = scalar_lea.vmem %s58_s16, 256  ;;  %p1045_p6 = scmp.lt.s32.totalorder %s58_s16, %s58_s16 }
  0x11   :  { %p1041_p5 = scmp.ne.s32.totalorder %s58_s16, %s1040_s20  ;;  %p1046_p7 = scmp.lt.s32.totalorder %s1040_s20, %s1040_s20 }
  0x13   :  { %p1047_p8 = por %p1046_p7, %p1045_p6 }
  0x15   :  { %p1048_p9 = pnand %p1047_p8, %p1041_p5 }
  0x17   :  { %1051 = shalt.err (!%p1048_p9)
}
  0x18   :  { %s1226_s21 = smov 64   ;;  %s1227_s22 = smov 4  }
  0x19   :  { %63 = dma.hbm_to_vmem [thread:$0]  %s1367_s3, 256, %s58_s16, [#allocation9], %s1226_s21, %s1226_s21, %s1227_s22  }
  0x1a   :  { %s1228_s25 = smov [#allocation11]   ;;  %s1229_s27 = smov [#allocation2]  }
  0x1b   :  { %s81_s26 = sshll.u32 %s1228_s25, 4  ;;  %s28_s1 = sshll.u32 %s1229_s27, 4  ;;  %s82_s26 = int_to_ptr.vmem [resolvable:$true] %s81_s26  ;;  %s29_s1 = int_to_ptr.vmem [resolvable:$true] %s28_s1 }
  0x1c   :  { %s1060_s28 = scalar_lea.vmem %s82_s26, 4096  ;;  %p1065_p11 = scmp.lt.s32.totalorder %s82_s26, %s82_s26 }
  0x1d   :  { %p1061_p10 = scmp.ne.s32.totalorder %s82_s26, %s1060_s28  ;;  %p1066_p12 = scmp.lt.s32.totalorder %s1060_s28, %s1060_s28 }
  0x1f   :  { %p1067_p13 = por %p1066_p12, %p1065_p11 }
  0x21   :  { %p1068_p0 = pnand %p1067_p13, %p1061_p10 }
  0x23   :  { %1071 = shalt.err (!%p1068_p0)
}
  0x24   :  { %s1230_s29 = smov 256   ;;  %s1231_s30 = smov 16  }
  0x25   :  { %87 = dma.hbm_to_vmem [thread:$0]  %s1369_s5, 4096, %s82_s26, [#allocation12], %s1230_s29, %s1230_s29, %s1231_s30  }
  0x26   :  { %s1080_s12 = scalar_lea.vmem %s29_s1, 128  ;;  %p1085_p2 = scmp.lt.s32.totalorder %s29_s1, %s29_s1 }
  0x27   :  { %p1081_p1 = scmp.ne.s32.totalorder %s29_s1, %s1080_s12  ;;  %p1086_p3 = scmp.lt.s32.totalorder %s1080_s12, %s1080_s12 }
  0x29   :  { %p1087_p4 = por %p1086_p3, %p1085_p2 }
  0x2b   :  { %p1088_p5 = pnand %p1087_p4, %p1081_p1 }
  0x2d   :  { %1091 = shalt.err (!%p1088_p5)
}
  0x2e   :  { %31 = dma.hbm_to_vmem [thread:$0]  %s1364_s0, 128, %s29_s1, [#allocation3]  }
  0x2f   :  { %s1232_s15 = smov [#allocation7]   ;;  %s1233_s17 = smov [#allocation10]  }
  0x30   :  { %s48_s16 = sshll.u32 %s1232_s15, 4  ;;  %s69_s18 = sshll.u32 %s1233_s17, 4  ;;  %s49_s16 = int_to_ptr.vmem [resolvable:$true] %s48_s16  ;;  %s70_s18 = int_to_ptr.vmem [resolvable:$true] %s69_s18 }
  0x31   :  { %s1100_s19 = scalar_lea.vmem %s49_s16, 128  ;;  %p1105_p7 = scmp.lt.s32.totalorder %s49_s16, %s49_s16 }
  0x32   :  { %p1101_p6 = scmp.ne.s32.totalorder %s49_s16, %s1100_s19  ;;  %p1106_p8 = scmp.lt.s32.totalorder %s1100_s19, %s1100_s19 }
  0x34   :  { %p1107_p9 = por %p1106_p8, %p1105_p7 }
  0x36   :  { %p1108_p10 = pnand %p1107_p9, %p1101_p6 }
  0x38   :  { %1111 = shalt.err (!%p1108_p10)
}
  0x39   :  { %51 = dma.hbm_to_vmem [thread:$0]  %s1366_s2, 128, %s49_s16, [#allocation6]  }
  0x3a   :  { %s1120_s23 = scalar_lea.vmem %s70_s18, 1024  ;;  %p1125_p12 = scmp.lt.s32.totalorder %s70_s18, %s70_s18 }
  0x3b   :  { %p1121_p11 = scmp.ne.s32.totalorder %s70_s18, %s1120_s23  ;;  %p1126_p13 = scmp.lt.s32.totalorder %s1120_s23, %s1120_s23 }
  0x3d   :  { %p1127_p0 = por %p1126_p13, %p1125_p12 }
  0x3f   :  { %p1128_p1 = pnand %p1127_p0, %p1121_p11 }
  0x41   :  { %1131 = shalt.err (!%p1128_p1)
}
  0x42   :  { %75 = dma.hbm_to_vmem [thread:$0]  %s1368_s4, 1024, %s70_s18, [#allocation9], %s1230_s29, %s1230_s29, %s1231_s30  }
  0x43   :  { %s1234_s25 = smov [#allocation13]  }
  0x44   :  { %s93_s26 = sshll.u32 %s1234_s25, 4  ;;  %s94_s26 = int_to_ptr.vmem [resolvable:$true] %s93_s26 }
  0x45   :  { %s1140_s27 = scalar_lea.vmem %s94_s26, 1024  ;;  %p1145_p3 = scmp.lt.s32.totalorder %s94_s26, %s94_s26 }
  0x46   :  { %p1141_p2 = scmp.ne.s32.totalorder %s94_s26, %s1140_s27  ;;  %p1146_p4 = scmp.lt.s32.totalorder %s1140_s27, %s1140_s27 }
  0x48   :  { %p1147_p5 = por %p1146_p4, %p1145_p3 }
  0x4a   :  { %p1148_p6 = pnand %p1147_p5, %p1141_p2 }
  0x4c   :  { %1151 = shalt.err (!%p1148_p6)
}
  0x4d   :  { %99 = dma.hbm_to_vmem [thread:$0]  %s1370_s6, 1024, %s94_s26, [#allocation12], %s1226_s21, %s1226_s21, %s1227_s22  }
  0x4e   :  { %1212 = dma.done.wait [#allocation3], 128  }
  0x4f   :  { %1213 = vsyncadd [#allocation3], 4294967168 }
  0x50   :  { %1214 = dma.done.wait [#allocation6], 256  }
  0x51   :  { %1215 = vsyncadd [#allocation6], 4294967040 }
  0x52   :  { %1216 = dma.done.wait [#allocation9], 1280  }
  0x53   :  { %1217 = vsyncadd [#allocation9], 4294966016 }
  0x54   :  { %1218 = dma.done.wait [#allocation12], 5120  }
  0x55   :  { %1219 = vsyncadd [#allocation12], 4294962176  ;;  %v1235_v0 = vmov 0.0   ;;  %vm1236_vm0 = vmmov 0   ;;  %v924_v1 = vld [vmem:[#allocation8 + $0x8] sm:$0xff]   ;;  %v925_v2 = vld [vmem:[#allocation8] sm:$0xff]  }
  0x56   :  { %879 = vmatprep.subr.bf16.mxu0 %v1235_v0  ;;  %883 = vmatprep.mubr.msk.bf16.mxu0 %vm1236_vm0, %v1235_v0  ;;  %v124_v3 = vld [vmem:[#allocation2] sm:$0xff]  ;;  %v932_v6 = vld [vmem:[#allocation11 + $0xe4] ss:$16 sps:$4 sm:$0xff]   ;;  %vm151_vm1 = vcmask 261120   ;;  %v937_v9 = vld [vmem:[#allocation11 + $0xe0] ss:$16 sps:$4 sm:$0xff]  }
  0x57   :  { %880 = vmatpush3.bf16.msra.mxu0 %v924_v1  ;;  %v928_v4 = vld [vmem:[#allocation11 + $0xec] ss:$16 sps:$4 sm:$0xff]   ;;  %v125_v5 = vpack.c.bf16 %v124_v3, %v124_v3  ;;  %v926_v7 = vld [vmem:[#allocation11 + $0xe8] ss:$16 sps:$4 sm:$0xff]   ;;  %398 = vmatprep.subr.bf16.mxu1 %v932_v6  ;;  %v938_v10 = vld [vmem:[#allocation11 + $0xc4] ss:$16 sps:$4 sm:$0xff]  }
  0x58   :  { %881 = vmatprep.subr.bf16.mxu0 %v1235_v0  ;;  %v931_v8 = vld [vmem:[#allocation11 + $0xcc] ss:$16 sps:$4 sm:$0xff]   ;;  %v929_v11 = vld [vmem:[#allocation11 + $0xc8] ss:$16 sps:$4 sm:$0xff]   ;;  %399 = vmatpush1.bf16.msra.mxu1 %v937_v9  ;;  %v943_v13 = vld [vmem:[#allocation11 + $0xc0] ss:$16 sps:$4 sm:$0xff]   ;;  %v607_v9 = vlaneseq }
  0x59   :  { %v936_v12 = vld [vmem:[#allocation11 + $0xac] ss:$16 sps:$4 sm:$0xff]   ;;  %400 = vmatprep.subr.bf16.mxu1 %v938_v10  ;;  %v944_v14 = vld [vmem:[#allocation11 + $0xa4] ss:$16 sps:$4 sm:$0xff]   ;;  %v934_v15 = vld [vmem:[#allocation11 + $0xa8] ss:$16 sps:$4 sm:$0xff]  }
  0x5a   :  { %v949_v16 = vld [vmem:[#allocation11 + $0xa0] ss:$16 sps:$4 sm:$0xff]   ;;  %v950_v17 = vld [vmem:[#allocation11 + $0x84] ss:$16 sps:$4 sm:$0xff]   ;;  %v942_v18 = vld [vmem:[#allocation11 + $0x8c] ss:$16 sps:$4 sm:$0xff]  }
  0x5b   :  { %882 = vmatpush3.bf16.msra.mxu0 %v925_v2  ;;  %v940_v19 = vld [vmem:[#allocation11 + $0x88] ss:$16 sps:$4 sm:$0xff]   ;;  %v955_v20 = vld [vmem:[#allocation11 + $0x80] ss:$16 sps:$4 sm:$0xff]   ;;  %v948_v21 = vld [vmem:[#allocation11 + $0x6c] ss:$16 sps:$4 sm:$0xff]  }
  0x5c   :  { %439 = vmatprep.subr.bf16.mxu0 %v928_v4  ;;  %401 = vmatpush1.bf16.msra.mxu1 %v943_v13  ;;  %v956_v22 = vld [vmem:[#allocation11 + $0x64] ss:$16 sps:$4 sm:$0xff]   ;;  %v961_v23 = vld [vmem:[#allocation11 + $0x60] ss:$16 sps:$4 sm:$0xff]   ;;  %v946_v24 = vld [vmem:[#allocation11 + $0x68] ss:$16 sps:$4 sm:$0xff]  }
  0x5d   :  { %402 = vmatprep.subr.bf16.mxu1 %v944_v14  ;;  %v954_v25 = vld [vmem:[#allocation11 + $0x4c] ss:$16 sps:$4 sm:$0xff]   ;;  %v952_v26 = vld [vmem:[#allocation11 + $0x48] ss:$16 sps:$4 sm:$0xff]   ;;  %v962_v29 = vld [vmem:[#allocation11 + $0x44] ss:$16 sps:$4 sm:$0xff]  }
  0x5e   :  { %884 = vmatmul.mubr.msk.bf16.vlgmr.msra.gmra.mxu0 %vm151_vm1, %v125_v5  ;;  %v960_v27 = vld [vmem:[#allocation11 + $0x2c] ss:$16 sps:$4 sm:$0xff]   ;;  %v958_v28 = vld [vmem:[#allocation11 + $0x28] ss:$16 sps:$4 sm:$0xff]   ;;  %v967_v32 = vld [vmem:[#allocation11 + $0x40] ss:$16 sps:$4 sm:$0xff]  }
  0x5f   :  { %440 = vmatpush1.bf16.msra.mxu0 %v926_v7  ;;  %v966_v30 = vld [vmem:[#allocation11 + $0xc] ss:$16 sps:$4 sm:$0xff]   ;;  %v964_v31 = vld [vmem:[#allocation11 + $0x8] ss:$16 sps:$4 sm:$0xff]   ;;  %v126_v33 = vld [vmem:[#allocation5] sm:$0xff]  ;;  %v1237_v36 = vmov 0  }
  0x60   :  { %441 = vmatprep.subr.bf16.mxu0 %v931_v8  ;;  %403 = vmatpush1.bf16.msra.mxu1 %v949_v16  ;;  %v968_v34 = vld [vmem:[#allocation11 + $0x24] ss:$16 sps:$4 sm:$0xff]   ;;  %v205_v35 = vpack.c.bf16 %v126_v33, %v126_v33  ;;  %v970_v37 = vld [vmem:[#allocation11 + $0x20] ss:$16 sps:$4 sm:$0xff]   ;;  %v982_v44 = vld [vmem:[#allocation10 + $0x2c] ss:$16 sps:$4 sm:$0xff]  }
  0x61   :  { %404 = vmatprep.subr.bf16.mxu1 %v950_v17  ;;  %471 = vmatprep.mubr.bf16.mxu0 %v1237_v36  ;;  %v971_v38 = vld [vmem:[#allocation11 + $0x4] ss:$16 sps:$4 sm:$0xff]   ;;  %v973_v39 = vld [vmem:[#allocation11] ss:$16 sps:$4 sm:$0xff]   ;;  %v812_v45 = vld [vmem:[%s1371_s7] ss:$0 sm:$0xff] }
  0x62   :  { %430 = vmatprep.mubr.bf16.mxu1 %v1237_v36  ;;  %v976_v40 = vld [vmem:[#allocation10 + $0x24] ss:$16 sps:$4 sm:$0xff]   ;;  %v974_v41 = vld [vmem:[#allocation10 + $0x20] ss:$16 sps:$4 sm:$0xff]   ;;  %v980_v52 = vld [vmem:[#allocation10 + $0x28] ss:$16 sps:$4 sm:$0xff]  }
  0x63   :  { %442 = vmatpush1.bf16.msra.mxu0 %v929_v11  ;;  %v979_v42 = vld [vmem:[#allocation10 + $0x4] ss:$16 sps:$4 sm:$0xff]   ;;  %v977_v43 = vld [vmem:[#allocation10] ss:$16 sps:$4 sm:$0xff]   ;;  %v985_v54 = vld [vmem:[#allocation10 + $0xc] ss:$16 sps:$4 sm:$0xff]  }
  0x64   :  { %443 = vmatprep.subr.bf16.mxu0 %v936_v12  ;;  %405 = vmatpush1.bf16.msra.mxu1 %v955_v20  ;;  %v983_v55 = vld [vmem:[#allocation10 + $0x8] ss:$16 sps:$4 sm:$0xff]   ;;  %v987_v2 = vld [vmem:[#allocation13 + $0x30] sm:$0xff]   ;;  %v989_v4 = vld [vmem:[#allocation13 + $0x20] sm:$0xff]   ;;  %v608_v10 = vshrl.u32 %v607_v9, 7  ;;  %s1238_s28 = smov [#allocation15]  }
  0x65   :  { %406 = vmatprep.subr.bf16.mxu1 %v956_v22  ;;  %v986_v1 = vld [vmem:[#allocation13 + $0x38] sm:$0xff]   ;;  %v988_v3 = vld [vmem:[#allocation13 + $0x28] sm:$0xff]   ;;  %v991_v6 = vld [vmem:[#allocation13 + $0x10] sm:$0xff]   ;;  %s783_s29 = sshll.u32 %s1238_s28, 4  ;;  %s784_s29 = int_to_ptr.vmem [resolvable:$true] %s783_s29 }
  0x66   :  { %v990_v5 = vld [vmem:[#allocation13 + $0x18] sm:$0xff]   ;;  %v992_v7 = vld [vmem:[#allocation13 + $0x8] sm:$0xff]   ;;  %v993_v8 = vld [vmem:[#allocation13] sm:$0xff]   ;;  %v609_v11 = vsub.s32 0, %v608_v10  ;;  %v613_v13 = vsub.s32 1, %v608_v10  ;;  %s1152_s30 = scalar_lea.vmem %s784_s29, 128  ;;  %p1157_p8 = scmp.lt.s32.totalorder %s784_s29, %s784_s29 }
  0x67   :  { %444 = vmatpush1.bf16.msra.mxu0 %v934_v15  ;;  %v605_v12 = vld [vmem:[%s1371_s7 + $0x1] sm:$0xf]  ;;  %p1153_p7 = scmp.ne.s32.totalorder %s784_s29, %s1152_s30  ;;  %p1158_p9 = scmp.lt.s32.totalorder %s1152_s30, %s1152_s30 }
  0x68   :  { %445 = vmatprep.subr.bf16.mxu0 %v942_v18  ;;  %407 = vmatpush1.bf16.msra.mxu1 %v961_v23  ;;  %v610_v14 = vrot.slane %v605_v12, %v609_v11  ;;  %v614_v17 = vrot.slane %v605_v12, %v613_v13 }
  0x69   :  { %408 = vmatprep.subr.bf16.mxu1 %v962_v29  ;;  %p1159_p10 = por %p1158_p9, %p1157_p8 }
  0x6b   :  { %446 = vmatpush1.bf16.msra.mxu0 %v940_v19  ;;  %p1160_p11 = pnand %p1159_p10, %p1153_p7 }
  0x6c   :  { %447 = vmatprep.subr.bf16.mxu0 %v948_v21  ;;  %409 = vmatpush1.bf16.msra.mxu1 %v967_v32 }
  0x6d   :  { %410 = vmatprep.subr.bf16.mxu1 %v968_v34  ;;  %v617_v34 = vsub.s32 2, %v608_v10 }
  0x6f   :  { %448 = vmatpush1.bf16.msra.mxu0 %v946_v24 }
  0x70   :  { %449 = vmatprep.subr.bf16.mxu0 %v954_v25  ;;  %411 = vmatpush1.bf16.msra.mxu1 %v970_v37 }
  0x71   :  { %412 = vmatprep.subr.bf16.mxu1 %v971_v38  ;;  %v618_v38 = vrot.slane %v605_v12, %v617_v34 }
  0x73   :  { %450 = vmatpush1.bf16.msra.mxu0 %v952_v26 }
  0x74   :  { %451 = vmatprep.subr.bf16.mxu0 %v960_v27  ;;  %413 = vmatpush1.bf16.msra.mxu1 %v973_v39 }
  0x75   :  { %887 = vmatprep.subr.bf16.mxu1 %v1235_v0 }
  0x77   :  { %452 = vmatpush1.bf16.msra.mxu0 %v958_v28  ;;  %431 = vmatmul.mubr.bf16.vlgmr.msra.gmra.mxu1 %v205_v35 }
  0x78   :  { %453 = vmatprep.subr.bf16.mxu0 %v966_v30  ;;  %903 = vmatprep.mubr.msk.bf16.mxu1 %vm1236_vm0, %v1235_v0 }
  0x79   :  { %888 = vmatpush3.bf16.msra.mxu1 %v986_v1 }
  0x7a   :  { %889 = vmatprep.subr.bf16.mxu1 %v1235_v0 }
  0x7b   :  { %454 = vmatpush1.bf16.msra.mxu0 %v964_v31 }
  0x7c   :  { %535 = vmatprep.subr.bf16.mxu0 %v976_v40 }
  0x7d   :  { %890 = vmatpush3.bf16.msra.mxu1 %v987_v2 }
  0x7e   :  { %472 = vmatmul.mubr.bf16.vlgmr.msra.gmra.mxu0 %v205_v35  ;;  %891 = vmatprep.subr.bf16.mxu1 %v1235_v0 }
  0x7f   :  { %555 = vmatprep.mubr.bf16.mxu0 %v1237_v36  ;;  %536 = vmatpush1.bf16.msra.mxu0 %v974_v41 }
  0x80   :  { %537 = vmatprep.subr.bf16.mxu0 %v979_v42 }
  0x81   :  { %892 = vmatpush3.bf16.msra.mxu1 %v988_v3 }
  0x82   :  { %893 = vmatprep.subr.bf16.mxu1 %v1235_v0 }
  0x83   :  { %538 = vmatpush1.bf16.msra.mxu0 %v977_v43 }
  0x84   :  { %576 = vmatprep.subr.bf16.mxu0 %v982_v44 }
  0x85   :  { %894 = vmatpush3.bf16.msra.mxu1 %v989_v4 }
  0x86   :  { %895 = vmatprep.subr.bf16.mxu1 %v1235_v0 }
  0x89   :  { %896 = vmatpush3.bf16.msra.mxu1 %v990_v5 }
  0x8a   :  { %897 = vmatprep.subr.bf16.mxu1 %v1235_v0 }
  0x8d   :  { %898 = vmatpush3.bf16.msra.mxu1 %v991_v6 }
  0x8e   :  { %899 = vmatprep.subr.bf16.mxu1 %v1235_v0 }
  0x91   :  { %900 = vmatpush3.bf16.msra.mxu1 %v992_v7 }
  0x92   :  { %901 = vmatprep.subr.bf16.mxu1 %v1235_v0  ;;  %v621_v0 = vsub.s32 3, %v608_v10 }
  0x94   :  { %v622_v29 = vrot.slane %v605_v12, %v621_v0 }
  0x95   :  { %902 = vmatpush3.bf16.msra.mxu1 %v993_v8 }
 0x11e   :  { %v189_v46 = vpop.f32.mrf.mxu0 }
 0x11f   :  { %v190_v47 = vadd.f32 %v812_v45, %v189_v46 }
 0x120   :  { %v885_v48 = vpop.f32.mrf.mxu0 }
 0x121   :  { %994 = vtanh.f32 %v190_v47  ;;  %v127_v47 = vld [vmem:[#allocation7] sm:$0xff] }
 0x122   :  { %v192_v49 = vpop.f32.mrf.mxu0 }
 0x124   :  { %v886_v50 = vpop.f32.mrf.mxu0 }
 0x12e   :  { %v995_v51 = vpop.eup %994 }
 0x12f   :  { %v196_v53 = vpack.c.bf16 %v995_v51, %v995_v51 }
 0x131   :  { %856 = vmatmul.mubr.msk.bf16.vlgmr.msra.gmra.mxu0 %vm151_vm1, %v196_v53 }
 0x132   :  { %577 = vmatpush1.bf16.msra.mxu0 %v980_v52  ;;  %596 = vmatprep.mubr.bf16.mxu0 %v1237_v36 }
 0x133   :  { %578 = vmatprep.subr.bf16.mxu0 %v985_v54 }
 0x136   :  { %579 = vmatpush1.bf16.msra.mxu0 %v983_v55 }
 0x137   :  { %v432_v60 = vpop.f32.mrf.mxu1 }
 0x139   :  { %857 = vmatmul.mubr.msk.bf16.vlgmr.msra.gmra.mxu0 %vm151_vm1, %v196_v53  ;;  %v434_v61 = vpop.f32.mrf.mxu1 }
 0x13b   :  { %v436_v62 = vpop.f32.mrf.mxu1 }
 0x13d   :  { %v437_v63 = vpop.f32.mrf.mxu1 }
 0x13e   :  { %v473_v56 = vpop.f32.mrf.mxu0 }
 0x140   :  { %v475_v57 = vpop.f32.mrf.mxu0 }
 0x142   :  { %v477_v58 = vpop.f32.mrf.mxu0 }
 0x144   :  { %v478_v59 = vpop.f32.mrf.mxu0 }
 0x1f1   :  { %v557_v15 = vpop.f32.mrf.mxu0 }
 0x1f2   :  { %v558_v16 = vadd.f32 %v557_v15, %v432_v60 }
 0x1f3   :  { %v559_v18 = vpop.f32.mrf.mxu0 }
 0x1f4   :  { %v627_v19 = vadd.f32 %v610_v14, %v558_v16  ;;  %v560_v20 = vadd.f32 %v559_v18, %v434_v61 }
 0x1f5   :  { %v561_v21 = vpop.f32.mrf.mxu0 }
 0x1f6   :  { %v631_v22 = vsub.f32 0.0, %v627_v19  ;;  %v628_v23 = vadd.f32 %v614_v17, %v560_v20 }
 0x1f7   :  { %v562_v24 = vpop.f32.mrf.mxu0 }
 0x1f8   :  { %v632_v25 = vmul.f32 1.442695, %v631_v22  ;;  %v636_v26 = vsub.f32 0.0, %v628_v23 }
 0x1f9   :  { %v598_v27 = vpop.f32.mrf.mxu0 }
 0x1fa   :  { %996 = vpow2.f32 %v632_v25  ;;  %v637_v28 = vmul.f32 1.442695, %v636_v26  ;;  %v599_v37 = vadd.f32 %v598_v27, %v473_v56 }
 0x1fb   :  { %v600_v30 = vpop.f32.mrf.mxu0 }
 0x1fc   :  { %998 = vpow2.f32 %v637_v28  ;;  %v601_v31 = vadd.f32 %v600_v30, %v475_v57  ;;  %v629_v41 = vadd.f32 %v618_v38, %v599_v37 }
 0x1fd   :  { %v602_v32 = vpop.f32.mrf.mxu0 }
 0x1fe   :  { %v630_v33 = vadd.f32 %v622_v29, %v601_v31 }
 0x1ff   :  { %v603_v35 = vpop.f32.mrf.mxu0 }
 0x200   :  { %v642_v36 = vsub.f32 0.0, %v630_v33 }
 0x202   :  { %v643_v39 = vmul.f32 1.442695, %v642_v36 }
 0x204   :  { %1000 = vpow2.f32 %v643_v39 }
 0x207   :  { %v997_v40 = vpop.eup %996 }
 0x208   :  { %v634_v42 = vadd.f32 1.0, %v997_v40 }
 0x209   :  { %v999_v43 = vpop.eup %998 }
 0x20a   :  { %1002 = vrcp.f32 %v634_v42  ;;  %v639_v44 = vadd.f32 1.0, %v999_v43 }
 0x20b   :  { %1004 = vtanh.f32 %v629_v41 }
 0x20c   :  { %1006 = vrcp.f32 %v639_v44 }
 0x211   :  { %v1001_v45 = vpop.eup %1000 }
 0x212   :  { %v645_v50 = vadd.f32 1.0, %v1001_v45 }
 0x214   :  { %1008 = vrcp.f32 %v645_v50 }
 0x217   :  { %v1003_v46 = vpop.eup %1002 }
 0x218   :  { %v1005_v48 = vpop.eup %1004 }
 0x219   :  { %v1007_v49 = vpop.eup %1006  ;;  %v648_v52 = vmul.f32 %v1005_v48, %v1003_v46 }
 0x21a   :  { %v647_v51 = vmul.f32 %v1007_v49, %v127_v47 }
 0x21c   :  { %v649_v53 = vadd.f32 %v648_v52, %v647_v51 }
 0x21e   :  { %1010 = vtanh.f32 %v649_v53  ;;  %766 = vst [vmem:[#allocation17] sm:$0xff] %v649_v53 }
 0x221   :  { %v1009_v54 = vpop.eup %1008 }
 0x22b   :  { %v1011_v55 = vpop.eup %1010 }
 0x22c   :  { %v651_v56 = vmul.f32 %v1011_v55, %v1009_v54 }
 0x22e   :  { %v652_v57 = vpack.c.bf16 %v651_v56, %v651_v56  ;;  %765 = vst [vmem:[#allocation15] sm:$0xff] %v651_v56 }
 0x230   :  { %904 = vmatmul.mubr.bf16.vlgmr.msra.gmra.mxu1 %v652_v57 }
 0x231   :  { %1163 = shalt.err (!%p1160_p11)
}
 0x232   :  { %786 = dma.vmem_to_hbm [thread:$0]  %s784_s29, 128, %s1373_s9, [#allocation16]  }
 0x233   :  { %s1239_s12 = smov [#allocation17]  }
 0x234   :  { %s793_s13 = sshll.u32 %s1239_s12, 4  ;;  %s794_s13 = int_to_ptr.vmem [resolvable:$true] %s793_s13 }
 0x235   :  { %s1172_s14 = scalar_lea.vmem %s794_s13, 128  ;;  %p1177_p13 = scmp.lt.s32.totalorder %s794_s13, %s794_s13 }
 0x236   :  { %p1173_p12 = scmp.ne.s32.totalorder %s794_s13, %s1172_s14  ;;  %p1178_p0 = scmp.lt.s32.totalorder %s1172_s14, %s1172_s14 }
 0x238   :  { %p1179_p1 = por %p1178_p0, %p1177_p13 }
 0x23a   :  { %p1180_p2 = pnand %p1179_p1, %p1173_p12 }
 0x23c   :  { %1183 = shalt.err (!%p1180_p2)
}
 0x23d   :  { %796 = dma.vmem_to_hbm [thread:$0]  %s794_s13, 128, %s1374_s10, [#allocation16]   ;;  %v858_v58 = vld [vmem:[%s1371_s7 + $0x5] ss:$0 sm:$0xff] }
 0x23e   :  { %s1240_s19 = smov [#allocation14]  }
 0x23f   :  { %s773_s9 = sshll.u32 %s1240_s19, 4  ;;  %s774_s9 = int_to_ptr.vmem [resolvable:$true] %s773_s9 }
 0x240   :  { %s1192_s5 = scalar_lea.vmem %s774_s9, 128  ;;  %p1197_p4 = scmp.lt.s32.totalorder %s774_s9, %s774_s9 }
 0x241   :  { %p1193_p3 = scmp.ne.s32.totalorder %s774_s9, %s1192_s5  ;;  %p1198_p5 = scmp.lt.s32.totalorder %s1192_s5, %s1192_s5 }
 0x243   :  { %p1199_p6 = por %p1198_p5, %p1197_p4 }
 0x245   :  { %p1200_p7 = pnand %p1199_p6, %p1193_p3 }
 0x2f0   :  { %v758_v59 = vpop.f32.mrf.mxu1 }
 0x2f1   :  { %v759_v60 = vadd.f32 %v858_v58, %v758_v59 }
 0x2f2   :  { %v905_v61 = vpop.f32.mrf.mxu1 }
 0x2f3   :  { %764 = vst [vmem:[#allocation14] sm:$0xff] %v759_v60 }
 0x2f4   :  { %v761_v62 = vpop.f32.mrf.mxu1 }
 0x2f5   :  { %1203 = shalt.err (!%p1200_p7)
}
 0x2f6   :  { %776 = dma.vmem_to_hbm [thread:$0]  %s774_s9, 128, %s1372_s8, [#allocation4]   ;;  %v906_v63 = vpop.f32.mrf.mxu1 }
 0x2f7   :  { %1220 = dma.done.wait [#allocation4], 128  }
 0x2f8   :  { %1221 = vsyncadd [#allocation4], 4294967168 }
 0x2f9   :  { %1222 = dma.done.wait [#allocation16], 256  }
 0x2fa   :  { %1223 = vsyncadd [#allocation16], 4294967040 }
 0x2fb   :  { %806 = vsyncpa [#allocation3], 1 }
 0x2fc   :  { %807 = vsyncpa [#allocation6], 1 }
 0x2fd   :  { %808 = vsyncpa [#allocation9], 1 }
 0x2fe   :  { %809 = vsyncpa [#allocation12], 1 }
 0x2ff   :  { %810 = vsyncpa [#allocation4], 1 }
 0x300   :  { %811 = vsyncpa [#allocation16], 1 }

</bundles_post_ra>
